<compile_context>
chip_gen: v7x
topology: tpu7x:2x2x1
jax: 0.10.0
libtpu: 0.0.40
codegen_flags: <defaults>
</compile_context>

<pallas_src>
import functools

import jax
import jax.numpy as jnp
from jax.experimental import pallas as pl
from jax.experimental.pallas import tpu as pltpu


def _rmsnorm2d_kernel(x_ref, scale_ref, *rest, eps, d_x, partial_elems, use_bias):
    if use_bias:
        offset_ref, o_ref = rest
    else:
        (o_ref,) = rest

    x = x_ref[...].astype(jnp.float32)                     # (TN, CHWp)

    if partial_elems is None:
        ss = jnp.sum(x * x, axis=1, keepdims=True)         # (TN, 1)
    else:
        # Channel-major flattening => first `partial_size` channels occupy
        # lanes [0, partial_size*HW). Mask-and-reduce stays on the VPU
        # (no sublane-boundary slice copy).
        lane = jax.lax.broadcasted_iota(jnp.int32, (1, x.shape[1]), 1)
        xp = jnp.where(lane < partial_elems, x, 0.0)
        ss = jnp.sum(xp * xp, axis=1, keepdims=True)

    # rms = ||x||_2 / sqrt(d_x);  y = scale * x / (rms + eps) (+ offset)
    rms = jnp.sqrt(ss) * (float(d_x) ** -0.5)              # (TN, 1)
    inv = 1.0 / (rms + eps)                                # eps outside sqrt (matches torch)
    scale = scale_ref[...].astype(jnp.float32)             # (1, CHWp)
    y = (x * inv) * scale
    if use_bias:
        y = y + offset_ref[...].astype(jnp.float32)
    o_ref[...] = y.astype(o_ref.dtype)


def _choose_block_rows(n, per_row_bytes, budget_bytes):
    """Samples per grid step. Legal values: n itself, or any multiple of 8."""
    cap = max(1, budget_bytes // max(per_row_bytes, 1))
    if n >= 16:
        # Keep >= 2 grid steps so the batch axis can shard across v7x's two
        # TensorCores (no-op on v5e/v6e).
        cap = min(cap, (n + 1) // 2)
    if cap >= n:
        return n
    if cap >= 8:
        return (cap // 8) * 8
    # A single sample already exceeds the budget: use the smallest legal tile
    # and raise the VMEM limit instead.
    # TODO(synk): for very large C*H*W (> ~12 MiB/sample on v7x's 64 MiB VMEM)
    # switch to an HW-chunked two-pass reduction instead of whole-sample blocks.
    return n if n < 8 else 8


def rmsnorm2d(x, scale, offset=None, *, p=-1.0, eps=1e-8, bias=False):
    """x: (N, C, H, W). scale/offset: (C, 1, 1)."""
    N, C, H, W = x.shape
    HW = H * W
    CHW = C * HW

    # ---- lane-dense flattening (pad reduction axis to a multiple of 128) ----
    CHWp = ((CHW + 127) // 128) * 128
    pad = CHWp - CHW

    x2 = x.reshape(N, CHW)
    if pad:
        # Zero padding does not change the sum of squares; padded outputs are
        # sliced off below. Only done when C*H*W is not already lane-aligned.
        x2 = jnp.pad(x2, ((0, 0), (0, pad)))

    def _row(param):
        r = jnp.broadcast_to(param.reshape(C, 1), (C, HW)).reshape(1, CHW)
        if pad:
            r = jnp.pad(r, ((0, 0), (0, pad)))
        return r

    inputs = [x2, _row(scale)]
    if bias:
        assert offset is not None, "bias=True requires an offset parameter"
        inputs.append(_row(offset))

    # ---- norm extent (full vs partial) ---------------------------------------
    if p < 0.0 or p > 1.0:
        partial_elems = None
        d_x = CHW
    else:
        partial_size = int(C * p)
        if partial_size < 1:
            raise ValueError("partial RMSNorm requires int(num_features * p) >= 1")
        partial_elems = partial_size * HW
        d_x = partial_elems

    # ---- tiling / explicit VMEM budget ---------------------------------------
    itemsize = jnp.dtype(x.dtype).itemsize
    param_itemsize = jnp.dtype(inputs[1].dtype).itemsize
    # (1, CHWp) param rows pad to 8 sublanes in VMEM; double-buffered.
    param_bytes = 2 * (len(inputs) - 1) * 8 * CHWp * param_itemsize
    per_row_bytes = 4 * CHWp * itemsize            # (in + out) x double buffering
    budget = (24 << 20) - param_bytes
    TN = _choose_block_rows(N, per_row_bytes, budget)
    grid = (pl.cdiv(N, TN),)

    footprint = TN * per_row_bytes + param_bytes
    vmem_limit = int(min(max(footprint + (4 << 20), 16 << 20), 64 << 20))

    kernel = functools.partial(
        _rmsnorm2d_kernel,
        eps=float(eps),
        d_x=d_x,
        partial_elems=partial_elems,
        use_bias=bool(bias),
    )

    param_spec = pl.BlockSpec((1, CHWp), lambda i: (0, 0))
    in_specs = [pl.BlockSpec((TN, CHWp), lambda i: (i, 0)), param_spec]
    if bias:
        in_specs.append(param_spec)

    out2 = pl.pallas_call(
        kernel,
        out_shape=jax.ShapeDtypeStruct((N, CHWp), x.dtype),
        grid_spec=pltpu.PrefetchScalarGridSpec(
            num_scalar_prefetch=0,
            grid=grid,
            in_specs=in_specs,
            out_specs=pl.BlockSpec((TN, CHWp), lambda i: (i, 0)),
        ),
        compiler_params=pltpu.CompilerParams(
            dimension_semantics=("parallel",),
            vmem_limit_bytes=vmem_limit,
        ),
    )(*inputs)

    if pad:
        out2 = out2[:, :CHW]
    return out2.reshape(N, C, H, W)


def rmsnorm2d_ref(x, scale, offset=None, *, p=-1.0, eps=1e-8, bias=False):
    """Pure-JAX reference mirroring the PyTorch forward exactly."""
    N, C, H, W = x.shape
    if p < 0.0 or p > 1.0:
        norm_x = jnp.sqrt(jnp.sum(x * x, axis=(1, 2, 3), keepdims=True))
        d_x = C * H * W
    else:
        partial_size = int(C * p)
        partial_x = x[:, :partial_size]
        norm_x = jnp.sqrt(jnp.sum(partial_x * partial_x,
                                  axis=(1, 2, 3), keepdims=True))
        d_x = partial_size * H * W
    rms_x = norm_x * d_x ** (-0.5)
    x_normed = x / (rms_x + eps)
    if bias:
        return scale[None] * x_normed + offset[None]
    return scale[None] * x_normed


if __name__ == "__main__":
    key = jax.random.PRNGKey(0)
    k_x, k_s, k_o = jax.random.split(key, 3)
    N, C, H, W = 2, 4, 16, 16

    x = jax.random.normal(k_x, (N, C, H, W), dtype=jnp.float32)

    # Case 1: module defaults (p=-1, bias=False, scale initialized to ones).
    scale1 = jnp.ones((C, 1, 1), dtype=jnp.float32)
    out1 = jax.block_until_ready(rmsnorm2d(x, scale1, p=-1.0, eps=1e-8, bias=False))
    ref1 = rmsnorm2d_ref(x, scale1, p=-1.0, eps=1e-8, bias=False)
    assert out1.shape == (N, C, H, W)
    assert jnp.allclose(out1, ref1, atol=1e-5, rtol=1e-5), "mismatch (default)"

    # Case 2: partial RMSNorm + bias with non-trivial parameters.
    scale2 = jax.random.normal(k_s, (C, 1, 1), dtype=jnp.float32)
    offset2 = jax.random.normal(k_o, (C, 1, 1), dtype=jnp.float32)
    out2 = jax.block_until_ready(
        rmsnorm2d(x, scale2, offset2, p=0.5, eps=1e-8, bias=True))
    ref2 = rmsnorm2d_ref(x, scale2, offset2, p=0.5, eps=1e-8, bias=True)
    assert jnp.allclose(out2, ref2, atol=1e-5, rtol=1e-5), "mismatch (partial+bias)"

    print("KERNEL_OK")
</pallas_src>

<mosaic_0001>
module attributes {stable_mosaic.version = 11 : i64} {
  func.func @_rmsnorm2d_kernel(%arg0: i32, %arg1: memref<2x1024xf32, #tpu.memory_space<vmem>>, %arg2: memref<1x1024xf32, #tpu.memory_space<vmem>>, %arg3: memref<2x1024xf32, #tpu.memory_space<vmem>>) attributes {dimension_semantics = [#tpu.dimension_semantics<parallel>], iteration_bounds = array<i64: 1>, scalar_prefetch = 0 : i64, scratch_operands = 0 : i64, tpu.core_type = #tpu.core_type<tc>, window_params = [{transform_indices = @transform_0, window_bounds = array<i64: 2, 1024>}, {pipeline_mode = #tpu.pipeline_mode<synchronous>, transform_indices = @transform_1, window_bounds = array<i64: 1, 1024>}, {transform_indices = @transform_2, window_bounds = array<i64: 2, 1024>}]} {
    %c0 = arith.constant 0 : index
    %c0_0 = arith.constant 0 : index
    %0 = vector.load %arg1[%c0, %c0_0] : memref<2x1024xf32, #tpu.memory_space<vmem>>, vector<2x1024xf32>
    %1 = arith.mulf %0, %0 : vector<2x1024xf32>
    %cst = arith.constant dense<0.000000e+00> : vector<2xf32>
    %2 = vector.multi_reduction <add>, %1, %cst [1] : vector<2x1024xf32> to vector<2xf32>
    %3 = vector.shape_cast %2 : vector<2xf32> to vector<2x1xf32>
    %4 = math.sqrt %3 : vector<2x1xf32>
    %cst_1 = arith.constant 3.125000e-02 : f32
    %5 = vector.broadcast %cst_1 : f32 to vector<2x1xf32>
    %6 = arith.mulf %4, %5 : vector<2x1xf32>
    %cst_2 = arith.constant 9.99999993E-9 : f32
    %7 = vector.broadcast %cst_2 : f32 to vector<2x1xf32>
    %8 = arith.addf %6, %7 : vector<2x1xf32>
    %cst_3 = arith.constant 1.000000e+00 : f32
    %9 = vector.broadcast %cst_3 : f32 to vector<2x1xf32>
    %10 = arith.divf %9, %8 : vector<2x1xf32>
    %c0_4 = arith.constant 0 : index
    %c0_5 = arith.constant 0 : index
    %11 = vector.load %arg2[%c0_4, %c0_5] : memref<1x1024xf32, #tpu.memory_space<vmem>>, vector<1x1024xf32>
    %12 = vector.broadcast %10 : vector<2x1xf32> to vector<2x1024xf32>
    %13 = arith.mulf %0, %12 : vector<2x1024xf32>
    %14 = vector.broadcast %11 : vector<1x1024xf32> to vector<2x1024xf32>
    %15 = arith.mulf %13, %14 : vector<2x1024xf32>
    %c0_6 = arith.constant 0 : index
    %c0_7 = arith.constant 0 : index
    %16 = vector.load %arg3[%c0_6, %c0_7] : memref<2x1024xf32, #tpu.memory_space<vmem>>, vector<2x1024xf32>
    tpu.vector_store %arg3[%c0_6, %c0_7], %15 {strides = array<i32>} : memref<2x1024xf32, #tpu.memory_space<vmem>>, vector<2x1024xf32>,
    return
  }
  func.func @transform_0(%arg0: i32) -> (i32, i32) {
    %c0_i32 = arith.constant 0 : i32
    %c0_i32_0 = arith.constant 0 : i32
    return %arg0, %c0_i32 : i32, i32
  }
  func.func @transform_1(%arg0: i32) -> (i32, i32) {
    %c0_i32 = arith.constant 0 : i32
    %c0_i32_0 = arith.constant 0 : i32
    %c0_i32_1 = arith.constant 0 : i32
    return %c0_i32, %c0_i32_0 : i32, i32
  }
  func.func @transform_2(%arg0: i32) -> (i32, i32) {
    %c0_i32 = arith.constant 0 : i32
    %c0_i32_0 = arith.constant 0 : i32
    return %arg0, %c0_i32 : i32, i32
  }
}

</mosaic_0001>

<bundles_post_ra>
// kernel: tpu_custom_call.1
= control target key start
LH: loop header
LB: loop body
LE: loop exit
PB: predicated region body
PF: predicated region fallthrough
CT: control target
= control target key end

     0   :  { %7 = vsyncpa [#allocation3], 0  ;;  %s391_s0 = inlined_call_operand.hbm [shape: f32[2,1024], index: 0, kind: input, shape index: {}]   ;;  %s392_s1 = inlined_call_operand.hbm [shape: f32[1,1024], index: 1, kind: input, shape index: {}]   ;;  %s393_s2 = inlined_call_operand.hbm [shape: f32[2,1024], index: 2, kind: output, shape index: {}]  }
   0x1   :  { %8 = vsyncpa [#allocation6], 0 }
   0x2   :  { %9 = vsyncpa [#allocation4], 0  ;;  %s295_s9 = smov [#allocation2]   ;;  %s296_s11 = smov [#allocation5]  }
   0x3   :  { %s16_s10 = sshll.u32 %s295_s9, 4  ;;  %s26_s12 = sshll.u32 %s296_s11, 4  ;;  %s17_s10 = int_to_ptr.vmem [resolvable:$true] %s16_s10  ;;  %s27_s12 = int_to_ptr.vmem [resolvable:$true] %s26_s12 }
   0x4   :  { %s223_s15 = scalar_lea.hbm %s391_s0, 256 }
   0x5   :  { %p224_p0 = scmp.ne.s32.totalorder %s391_s0, %s223_s15  ;;  %p227_p1 = scmp.lt.u32.totalorder %s223_s15, %s391_s0 }
   0x7   :  { %p229_p2 = pnand %p227_p1, %p224_p0 }
   0x9   :  { %232 = shalt.err (!%p229_p2)
}
   0xa   :  { %s233_s20 = scalar_lea.vmem %s17_s10, 256  ;;  %p238_p4 = scmp.lt.s32.totalorder %s17_s10, %s17_s10 }
   0xb   :  { %p234_p3 = scmp.ne.s32.totalorder %s17_s10, %s233_s20  ;;  %p239_p5 = scmp.lt.s32.totalorder %s233_s20, %s233_s20 }
   0xd   :  { %p240_p6 = por %p239_p5, %p238_p4 }
   0xf   :  { %p241_p7 = pnand %p240_p6, %p234_p3 }
  0x11   :  { %244 = shalt.err (!%p241_p7)
}
  0x12   :  { %19 = dma.hbm_to_vmem [thread:$0]  %s391_s0, 256, %s17_s10, [#allocation3]  }
  0x13   :  { %s245_s25 = scalar_lea.hbm %s392_s1, 128 }
  0x14   :  { %p246_p8 = scmp.ne.s32.totalorder %s392_s1, %s245_s25  ;;  %p249_p9 = scmp.lt.u32.totalorder %s245_s25, %s392_s1 }
  0x16   :  { %p251_p10 = pnand %p249_p9, %p246_p8 }
  0x18   :  { %254 = shalt.err (!%p251_p10)
}
  0x19   :  { %s255_s30 = scalar_lea.vmem %s27_s12, 128  ;;  %p260_p12 = scmp.lt.s32.totalorder %s27_s12, %s27_s12 }
  0x1a   :  { %p256_p11 = scmp.ne.s32.totalorder %s27_s12, %s255_s30  ;;  %p261_p13 = scmp.lt.s32.totalorder %s255_s30, %s255_s30 }
  0x1c   :  { %p262_p0 = por %p261_p13, %p260_p12 }
  0x1e   :  { %p263_p1 = pnand %p262_p0, %p256_p11 }
  0x20   :  { %266 = shalt.err (!%p263_p1)
}
  0x21   :  { %29 = dma.hbm_to_vmem [thread:$0]  %s392_s1, 128, %s27_s12, [#allocation6]  }
  0x22   :  { %289 = dma.done.wait [#allocation3], 256  }
  0x23   :  { %290 = vsyncadd [#allocation3], 4294967040 }
  0x24   :  { %291 = dma.done.wait [#allocation6], 128  }
  0x25   :  { %292 = vsyncadd [#allocation6], 4294967168  ;;  %v46_v0 = vlaneseq  ;;  %v297_v1 = vmov 1983009808   ;;  %v344_v6 = vld [vmem:[#allocation2] sm:$0xff]  ;;  %v346_v7 = vld [vmem:[#allocation2 + $0x8] sm:$0xff] }
  0x26   :  { %v44_v2 = vunpack.c.l.s4 %v297_v1  ;;  %v38_v8 = vmul.f32 %v344_v6, %v344_v6  ;;  %v39_v9 = vmul.f32 %v346_v7, %v346_v7  ;;  %vm84_vm0 = vcmask 1041408   ;;  %v113_v43 = vld [vmem:[#allocation5] sm:$0xff]  ;;  %s299_s1 = smov [#allocation7]  }
  0x27   :  { %v339_v3 = vshrl.u32 %v46_v0, 7  ;;  %v298_v51 = vmov 269488144   ;;  %s204_s4 = sshll.u32 %s299_s1, 4  ;;  %s205_s4 = int_to_ptr.vmem [resolvable:$true] %s204_s4 }
  0x28   :  { %v45_v4 = vunpack.c.0.s8 %v44_v2  ;;  %v42_v10 = vcombine.high %v38_v8, %v38_v8  ;;  %v59_v14 = vcombine.high %v39_v9, %v39_v9  ;;  %v116_v52 = vunpack.c.l.s4 %v298_v51  ;;  %s267_s5 = scalar_lea.vmem %s205_s4, 256  ;;  %p272_p3 = scmp.lt.s32.totalorder %s205_s4, %s205_s4 }
  0x29   :  { %v128_v38 = vsub.s32 0, %v339_v3  ;;  %v132_v40 = vsub.s32 1, %v339_v3  ;;  %v136_v41 = vsub.s32 2, %v339_v3  ;;  %v140_v44 = vsub.s32 3, %v339_v3  ;;  %p268_p2 = scmp.ne.s32.totalorder %s205_s4, %s267_s5  ;;  %p273_p4 = scmp.lt.s32.totalorder %s267_s5, %s267_s5 }
  0x2a   :  { %v342_v5 = vsub.s32 %v45_v4, %v339_v3  ;;  %v144_v45 = vsub.s32 4, %v339_v3  ;;  %v148_v47 = vsub.s32 5, %v339_v3  ;;  %v152_v48 = vsub.s32 6, %v339_v3 }
  0x2b   :  { %v156_v49 = vsub.s32 7, %v339_v3  ;;  %v129_v53 = vrot.slane %v113_v43, %v128_v38  ;;  %v133_v55 = vrot.slane %v113_v43, %v132_v40  ;;  %v137_v56 = vrot.slane %v113_v43, %v136_v41  ;;  %p274_p5 = por %p273_p4, %p272_p3 }
  0x2c   :  { %v49_v11 = vrot.slane %v38_v8, %v342_v5  ;;  %v56_v12 = vrot.slane %v42_v10, %v342_v5  ;;  %v66_v15 = vrot.slane %v39_v9, %v342_v5  ;;  %v73_v21 = vrot.slane %v59_v14, %v342_v5 }
  0x2d   :  { %v141_v57 = vrot.slane %v113_v43, %v140_v44  ;;  %v145_v58 = vrot.slane %v113_v43, %v144_v45  ;;  %v149_v59 = vrot.slane %v113_v43, %v148_v47  ;;  %v153_v60 = vrot.slane %v113_v43, %v152_v48  ;;  %p275_p6 = pnand %p274_p5, %p268_p2 }
  0x2e   :  { %v57_v13 = vcombine.high %v49_v11, %v49_v11  ;;  %v85_v16 = vsel %vm84_vm0, %v49_v11, 0.0  ;;  %v58_v17 = vcombine.high %v56_v12, %v56_v12  ;;  %v88_v19 = vsel %vm84_vm0, %v56_v12, 0.0 }
  0x2f   :  { %v74_v22 = vcombine.high %v66_v15, %v66_v15  ;;  %v92_v25 = vsel %vm84_vm0, %v66_v15, 0.0  ;;  %v75_v27 = vcombine.high %v73_v21, %v73_v21  ;;  %v96_v30 = vsel %vm84_vm0, %v73_v21, 0.0 }
  0x30   :  { %v86_v18 = vsel %vm84_vm0, %v57_v13, 0.0  ;;  %v90_v23 = vsel %vm84_vm0, %v58_v17, 0.0  ;;  %v157_v61 = vrot.slane %v113_v43, %v156_v49  ;;  %v117_v62 = vunpack.c.0.s8 %v116_v52 }
  0x31   :  { %v87_v20 = vadd.f32 %v86_v18, %v85_v16  ;;  %v94_v28 = vsel %vm84_vm0, %v74_v22, 0.0  ;;  %v98_v32 = vsel %vm84_vm0, %v75_v27, 0.0  ;;  %v158_v63 = vcombine.low %v129_v53, %v133_v55 }
  0x32   :  { %v159_v0 = vcombine.low %v137_v56, %v141_v57  ;;  %v175_v1 = vcombine.low %v145_v58, %v149_v59  ;;  %v176_v2 = vcombine.low %v153_v60, %v157_v61  ;;  %v120_v4 = vsub.s32 %v117_v62, %v339_v3 }
  0x33   :  { %v89_v24 = vadd.f32 %v88_v19, %v87_v20  ;;  %v166_v8 = vrot.slane %v158_v63, %v342_v5 }
  0x34   :  { %v173_v9 = vrot.slane %v159_v0, %v342_v5  ;;  %v183_v10 = vrot.slane %v175_v1, %v342_v5  ;;  %v190_v11 = vrot.slane %v176_v2, %v342_v5 }
  0x35   :  { %v91_v26 = vadd.f32 %v90_v23, %v89_v24 }
  0x36   :  { %v174_v14 = vcombine.low %v166_v8, %v173_v9  ;;  %v191_v15 = vcombine.low %v183_v10, %v190_v11 }
  0x37   :  { %v93_v29 = vadd.f32 %v92_v25, %v91_v26 }
  0x39   :  { %v95_v31 = vadd.f32 %v94_v28, %v93_v29 }
  0x3b   :  { %v97_v33 = vadd.f32 %v96_v30, %v95_v31 }
  0x3d   :  { %v99_v34 = vadd.f32 %v98_v32, %v97_v33 }
  0x3f   :  { %100 = vadd.xlane.f32.xlu0 %v99_v34 }
  0xcc   :  { %v101_v35 = vpop.xlane.xlu0 %100 }
  0xcd   :  { %219 = vrsqrt.f32 %v101_v35  ;;  %vm104_vm1 = vcmp.eq.f32.partialorder %v101_v35, inf  ;;  %v107_v39 = vand.u32 2147483648, %v101_v35  ;;  %vm106_vm2 = vcmp.eq.f32.partialorder %v101_v35, 0.0 }
  0xd7   :  { %v220_v36 = vpop.eup %219 }
  0xd8   :  { %v103_v37 = vmul.f32 %v220_v36, %v101_v35 }
  0xda   :  { %v105_v42 = vsel %vm104_vm1, %v101_v35, %v103_v37 }
  0xdb   :  { %v108_v46 = vsel %vm106_vm2, %v107_v39, %v105_v42 }
  0xdc   :  { %v109_v50 = vmul.f32 0.03125, %v108_v46 }
  0xde   :  { %v110_v54 = vadd.f32 1e-08, %v109_v50 }
  0xe0   :  { %221 = vrcp.f32 %v110_v54 }
  0xea   :  { %v222_v12 = vpop.eup %221 }
  0xeb   :  { %v121_v13 = vrot.slane %v222_v12, %v120_v4 }
  0xed   :  { %v123_v16 = vmul.f32 %v121_v13, %v344_v6  ;;  %v124_v17 = vmul.f32 %v121_v13, %v346_v7 }
  0xef   :  { %v194_v18 = vmul.f32 %v174_v14, %v123_v16  ;;  %v195_v3 = vmul.f32 %v191_v15, %v124_v17 }
  0xf1   :  { %196 = vst [vmem:[#allocation7] sm:$0xff] %v194_v18  ;;  %197 = vst [vmem:[#allocation7 + $0x8] sm:$0xff] %v195_v3 }
  0xf2   :  { %278 = shalt.err (!%p275_p6)
}
  0xf3   :  { %s279_s8 = scalar_lea.hbm %s393_s2, 256 }
  0xf4   :  { %p280_p7 = scmp.ne.s32.totalorder %s393_s2, %s279_s8  ;;  %p283_p8 = scmp.lt.u32.totalorder %s279_s8, %s393_s2 }
  0xf6   :  { %p285_p9 = pnand %p283_p8, %p280_p7 }
  0xf8   :  { %288 = shalt.err (!%p285_p9)
}
  0xf9   :  { %207 = dma.vmem_to_hbm [thread:$0]  %s205_s4, 256, %s393_s2, [#allocation4]  }
  0xfa   :  { %293 = dma.done.wait [#allocation4], 256  }
  0xfb   :  { %294 = vsyncadd [#allocation4], 4294967040 }
  0xfc   :  { %211 = vsyncpa [#allocation3], 1 }
  0xfd   :  { %212 = vsyncpa [#allocation6], 1 }
  0xfe   :  { %213 = vsyncpa [#allocation4], 1 }

</bundles_post_ra>
